<compile_context>
chip_gen: v7x
topology: tpu7x:2x2x1
jax: 0.10.0
libtpu: 0.0.40
codegen_flags: <defaults>
</compile_context>

<pallas_src>
import functools

import jax
import jax.numpy as jnp
from jax.experimental import pallas as pl
from jax.experimental.pallas import tpu as pltpu


def _gauss_fix_kernel(planes_ref, g_ref, o_ref, *, tap_plane, tap_off, lpad):
    """One (batch-image, Cout-tile) grid step.

    planes_ref : (1, n_planes, Ppad)  stride-de-interleaved, halo-padded,
                 row-flattened channel-summed image planes (f32)
    g_ref      : (1, TCout, 9)        folded 3x3 taps (diff branch folded in)
    o_ref      : (1, TCout, lpad)     lane-dense flat output (lpad % 128 == 0)

    out[0, o, q] = sum_t g[0, o, t] * planes[0, tap_plane[t], q + tap_off[t]]

    Nine shifted scalar-vector multiply-adds on the VPU; no MXU, no in-kernel
    reshapes; every tap window is a contiguous lane slice of a flat plane.
    """
    g = g_ref[...].astype(jnp.float32)                           # (1, TCout, 9)

    def tap(t):
        p, off = tap_plane[t], tap_off[t]
        sl = planes_ref[:, p, off:off + lpad].astype(jnp.float32)   # (1, lpad)
        return g[:, :, t:t + 1] * sl[:, None, :]                 # (1, TCout, lpad)

    acc = tap(0)                      # init from tap 0: no zero-fill + extra add
    for t in range(1, 9):             # unrolled at trace time
        acc = acc + tap(t)
    o_ref[...] = acc.astype(o_ref.dtype)


def _pick_cout_tile(cout, out_row_bytes, budget=4 * 1024 * 1024):
    """Largest multiple-of-8 divisor of cout whose output block fits `budget`."""
    if cout <= 8 or cout % 8 != 0:
        return cout
    best = 8
    for t in range(8, cout + 1, 8):
        if cout % t == 0 and t * out_row_bytes <= budget:
            best = t
    return best


def conv2d_gaussian_fix(x, weight, theta=0.7, stride=1):
    """Fused Conv2d_Gaussian_fix forward (3x3, padding=1, bias=False).

    x:      (N, Cin, H, W)   NCHW (PyTorch layout)
    weight: (Cout, Cin, 3, 3) nn.Conv2d weight
    Returns (N, Cout, Ho, Wo) in NCHW with Ho = (H - 1)//stride + 1.
    """
    N, Cin, H, W = x.shape
    Cout = weight.shape[0]
    s = int(stride)
    f32 = jnp.float32

    # --- weight prep (tiny plain-JAX glue on a (Cout,3,3) tensor) ------------
    gauss = jnp.array([[1., 2., 1.], [2., 4., 2.], [1., 2., 1.]], dtype=f32) / 16.0
    wsum = weight.astype(f32).sum(axis=1)                        # (Cout, 3, 3)
    wpad = jnp.pad(wsum, ((0, 0), (1, 1), (1, 1)))               # (Cout, 5, 5)
    g3 = sum(gauss[di, dj] * wpad[:, di:di + 3, dj:dj + 3]
             for di in range(3) for dj in range(3))              # (Cout, 3, 3)
    # Fold -theta * (1x1 diff branch) into the centre tap.
    g3 = g3.at[:, 1, 1].add(-theta * g3.sum(axis=(1, 2)))
    gtaps = g3.reshape(1, Cout, 9)                               # tap-major

    # --- activation prep: channel sum + halo + stride de-interleave ----------
    Ho = (H - 1) // s + 1
    Wo = (W - 1) // s + 1
    qmax = 2 // s                         # max per-axis tap block-offset
    R = Ho + qmax                         # plane rows
    C = Wo + qmax                         # plane cols == output flat row width
    need_h, need_w = s * R, s * C

    xs = x.astype(f32).sum(axis=1)                               # (N, H, W)
    xp = jnp.pad(xs, ((0, 0),
                      (1, max(1, need_h - H - 1)),
                      (1, max(1, need_w - W - 1))))              # halo + align pad
    # s*s de-interleaved planes: P[a*s+b][r, c] = xp[s*r + a, s*c + b]
    planes = jnp.stack(
        [xp[:, a::s, b::s][:, :R, :C] for a in range(s) for b in range(s)],
        axis=1)                                                  # (N, s*s, R, C)
    n_planes = s * s

    L = Ho * C                                                   # valid out lanes
    Lpad = ((L + 127) // 128) * 128                              # dense stores
    max_off = qmax * C + qmax
    Ppad = ((max_off + Lpad + 127) // 128) * 128
    planes_flat = jnp.pad(planes.reshape(N, n_planes, R * C),
                          ((0, 0), (0, 0), (0, Ppad - R * C)))   # (N, s*s, Ppad)

    # Static tap -> (plane, flat offset) mapping (stride folded here).
    tap_plane = tuple((di % s) * s + (dj % s)
                      for di in range(3) for dj in range(3))
    tap_off = tuple((di // s) * C + (dj // s)
                    for di in range(3) for dj in range(3))

    out_dtype = x.dtype
    out_bytes = jnp.dtype(out_dtype).itemsize
    tcout = _pick_cout_tile(Cout, Lpad * out_bytes)
    ncout = Cout // tcout

    vmem_needed = 2 * (n_planes * Ppad * 4 + tcout * 128 * 4
                       + tcout * Lpad * out_bytes) + (2 << 20)
    vmem_limit = int(min(max(vmem_needed, 32 << 20), 48 << 20))

    kernel = functools.partial(_gauss_fix_kernel, tap_plane=tap_plane,
                               tap_off=tap_off, lpad=Lpad)
    out_flat = pl.pallas_call(
        kernel,
        out_shape=jax.ShapeDtypeStruct((N, Cout, Lpad), out_dtype),
        grid=(N, ncout),
        in_specs=[
            pl.BlockSpec((1, n_planes, Ppad), lambda n, j: (n, 0, 0)),
            pl.BlockSpec((1, tcout, 9), lambda n, j: (0, j, 0)),
        ],
        out_specs=pl.BlockSpec((1, tcout, Lpad), lambda n, j: (n, j, 0)),
        compiler_params=pltpu.CompilerParams(
            dimension_semantics=("parallel", "parallel"),
            vmem_limit_bytes=vmem_limit),
    )(planes_flat, gtaps)

    # Crop garbage tail lanes + per-row pad columns, back to NCHW.
    # TODO(synk): fuse this crop into the downstream BatchNorm/LeakyReLU kernel
    # to remove the extra HBM pass over the output.
    out = out_flat[:, :, :L].reshape(N, Cout, Ho, C)[:, :, :, :Wo]
    return out


def _reference(x, weight, theta=0.7, stride=1):
    """Pure-JAX reference mirroring the PyTorch Conv2d_Gaussian_fix.forward."""
    Cout, Cin, _, _ = weight.shape
    gauss = jnp.array([[1., 2., 1.], [2., 4., 2.], [1., 2., 1.]],
                      dtype=weight.dtype) / 16.0
    smooth = jnp.ones((Cin, Cin, 3, 3), dtype=weight.dtype) * gauss
    conv_weight = jax.lax.conv_general_dilated(
        weight, smooth, window_strides=(1, 1), padding=((1, 1), (1, 1)),
        dimension_numbers=("NCHW", "OIHW", "NCHW"))
    out_normal = jax.lax.conv_general_dilated(
        x, conv_weight, window_strides=(stride, stride), padding=((1, 1), (1, 1)),
        dimension_numbers=("NCHW", "OIHW", "NCHW"))
    if abs(theta) < 1e-8:
        return out_normal
    kdiff = conv_weight.sum(axis=(2, 3))[:, :, None, None]
    out_diff = jax.lax.conv_general_dilated(
        x, kdiff, window_strides=(stride, stride), padding=((0, 0), (0, 0)),
        dimension_numbers=("NCHW", "OIHW", "NCHW"))
    return out_normal - theta * out_diff


if __name__ == "__main__":
    key = jax.random.PRNGKey(0)
    kx, kw = jax.random.split(key)

    N, Cin, Cout, H, W = 2, 4, 8, 16, 16
    theta = 0.7

    x = jax.random.normal(kx, (N, Cin, H, W), dtype=jnp.float32)
    # Deterministic stand-in for the nn.Conv2d(3x3, bias=False) weight.
    weight = jax.random.normal(kw, (Cout, Cin, 3, 3), dtype=jnp.float32) * 0.1

    # stride=1 (module default)
    out1 = jax.block_until_ready(conv2d_gaussian_fix(x, weight, theta, stride=1))
    ref1 = _reference(x, weight, theta, stride=1)
    assert out1.shape == ref1.shape == (N, Cout, H, W)
    assert jnp.allclose(out1, ref1, atol=1e-4, rtol=1e-4), "stride-1 mismatch"

    # stride=2 (configuration used by every BetaVAE encoder block) —
    # stride is now folded into the kernel (only Ho*Wo lanes computed/stored).
    out2 = jax.block_until_ready(conv2d_gaussian_fix(x, weight, theta, stride=2))
    ref2 = _reference(x, weight, theta, stride=2)
    assert out2.shape == ref2.shape == (N, Cout, H // 2, W // 2)
    assert jnp.allclose(out2, ref2, atol=1e-4, rtol=1e-4), "stride-2 mismatch"

    print("KERNEL_OK")
</pallas_src>

<mosaic_0001>
module attributes {stable_mosaic.version = 11 : i64} {
  func.func @_gauss_fix_kernel(%arg0: i32, %arg1: i32, %arg2: memref<1x1x512xf32, #tpu.memory_space<vmem>>, %arg3: memref<1x8x9xf32, #tpu.memory_space<vmem>>, %arg4: memref<1x8x384xf32, #tpu.memory_space<vmem>>) attributes {dimension_semantics = [#tpu.dimension_semantics<parallel>, #tpu.dimension_semantics<parallel>], iteration_bounds = array<i64: 2, 1>, scalar_prefetch = 0 : i64, scratch_operands = 0 : i64, tpu.core_type = #tpu.core_type<tc>, window_params = [{transform_indices = @transform_0, window_bounds = array<i64: 1, 1, 512>}, {transform_indices = @transform_1, window_bounds = array<i64: 1, 8, 9>}, {transform_indices = @transform_2, window_bounds = array<i64: 1, 8, 384>}]} {
    %c0 = arith.constant 0 : index
    %c0_0 = arith.constant 0 : index
    %c0_1 = arith.constant 0 : index
    %0 = vector.load %arg3[%c0, %c0_0, %c0_1] : memref<1x8x9xf32, #tpu.memory_space<vmem>>, vector<1x8x9xf32>
    %c0_2 = arith.constant 0 : index
    %c0_3 = arith.constant 0 : index
    %c0_4 = arith.constant 0 : index
    %1 = vector.load %arg2[%c0_2, %c0_3, %c0_4] : memref<1x1x512xf32, #tpu.memory_space<vmem>>, vector<1x1x384xf32>
    %2 = vector.shape_cast %1 : vector<1x1x384xf32> to vector<1x384xf32>
    %3 = vector.extract_strided_slice %0 {offsets = [0, 0, 0], sizes = [1, 8, 1], strides = [1, 1, 1]} : vector<1x8x9xf32> to vector<1x8x1xf32>
    %4 = vector.shape_cast %2 : vector<1x384xf32> to vector<1x1x384xf32>
    %5 = vector.broadcast %3 : vector<1x8x1xf32> to vector<1x8x384xf32>
    %6 = vector.broadcast %4 : vector<1x1x384xf32> to vector<1x8x384xf32>
    %7 = arith.mulf %5, %6 : vector<1x8x384xf32>
    %c0_5 = arith.constant 0 : index
    %c0_6 = arith.constant 0 : index
    %c1 = arith.constant 1 : index
    %8 = vector.load %arg2[%c0_5, %c0_6, %c1] : memref<1x1x512xf32, #tpu.memory_space<vmem>>, vector<1x1x384xf32>
    %9 = vector.shape_cast %8 : vector<1x1x384xf32> to vector<1x384xf32>
    %10 = vector.extract_strided_slice %0 {offsets = [0, 0, 1], sizes = [1, 8, 1], strides = [1, 1, 1]} : vector<1x8x9xf32> to vector<1x8x1xf32>
    %11 = vector.shape_cast %9 : vector<1x384xf32> to vector<1x1x384xf32>
    %12 = vector.broadcast %10 : vector<1x8x1xf32> to vector<1x8x384xf32>
    %13 = vector.broadcast %11 : vector<1x1x384xf32> to vector<1x8x384xf32>
    %14 = arith.mulf %12, %13 : vector<1x8x384xf32>
    %15 = arith.addf %7, %14 : vector<1x8x384xf32>
    %c0_7 = arith.constant 0 : index
    %c0_8 = arith.constant 0 : index
    %c2 = arith.constant 2 : index
    %16 = vector.load %arg2[%c0_7, %c0_8, %c2] : memref<1x1x512xf32, #tpu.memory_space<vmem>>, vector<1x1x384xf32>
    %17 = vector.shape_cast %16 : vector<1x1x384xf32> to vector<1x384xf32>
    %18 = vector.extract_strided_slice %0 {offsets = [0, 0, 2], sizes = [1, 8, 1], strides = [1, 1, 1]} : vector<1x8x9xf32> to vector<1x8x1xf32>
    %19 = vector.shape_cast %17 : vector<1x384xf32> to vector<1x1x384xf32>
    %20 = vector.broadcast %18 : vector<1x8x1xf32> to vector<1x8x384xf32>
    %21 = vector.broadcast %19 : vector<1x1x384xf32> to vector<1x8x384xf32>
    %22 = arith.mulf %20, %21 : vector<1x8x384xf32>
    %23 = arith.addf %15, %22 : vector<1x8x384xf32>
    %c0_9 = arith.constant 0 : index
    %c0_10 = arith.constant 0 : index
    %c18 = arith.constant 18 : index
    %24 = vector.load %arg2[%c0_9, %c0_10, %c18] : memref<1x1x512xf32, #tpu.memory_space<vmem>>, vector<1x1x384xf32>
    %25 = vector.shape_cast %24 : vector<1x1x384xf32> to vector<1x384xf32>
    %26 = vector.extract_strided_slice %0 {offsets = [0, 0, 3], sizes = [1, 8, 1], strides = [1, 1, 1]} : vector<1x8x9xf32> to vector<1x8x1xf32>
    %27 = vector.shape_cast %25 : vector<1x384xf32> to vector<1x1x384xf32>
    %28 = vector.broadcast %26 : vector<1x8x1xf32> to vector<1x8x384xf32>
    %29 = vector.broadcast %27 : vector<1x1x384xf32> to vector<1x8x384xf32>
    %30 = arith.mulf %28, %29 : vector<1x8x384xf32>
    %31 = arith.addf %23, %30 : vector<1x8x384xf32>
    %c0_11 = arith.constant 0 : index
    %c0_12 = arith.constant 0 : index
    %c19 = arith.constant 19 : index
    %32 = vector.load %arg2[%c0_11, %c0_12, %c19] : memref<1x1x512xf32, #tpu.memory_space<vmem>>, vector<1x1x384xf32>
    %33 = vector.shape_cast %32 : vector<1x1x384xf32> to vector<1x384xf32>
    %34 = vector.extract_strided_slice %0 {offsets = [0, 0, 4], sizes = [1, 8, 1], strides = [1, 1, 1]} : vector<1x8x9xf32> to vector<1x8x1xf32>
    %35 = vector.shape_cast %33 : vector<1x384xf32> to vector<1x1x384xf32>
    %36 = vector.broadcast %34 : vector<1x8x1xf32> to vector<1x8x384xf32>
    %37 = vector.broadcast %35 : vector<1x1x384xf32> to vector<1x8x384xf32>
    %38 = arith.mulf %36, %37 : vector<1x8x384xf32>
    %39 = arith.addf %31, %38 : vector<1x8x384xf32>
    %c0_13 = arith.constant 0 : index
    %c0_14 = arith.constant 0 : index
    %c20 = arith.constant 20 : index
    %40 = vector.load %arg2[%c0_13, %c0_14, %c20] : memref<1x1x512xf32, #tpu.memory_space<vmem>>, vector<1x1x384xf32>
    %41 = vector.shape_cast %40 : vector<1x1x384xf32> to vector<1x384xf32>
    %42 = vector.extract_strided_slice %0 {offsets = [0, 0, 5], sizes = [1, 8, 1], strides = [1, 1, 1]} : vector<1x8x9xf32> to vector<1x8x1xf32>
    %43 = vector.shape_cast %41 : vector<1x384xf32> to vector<1x1x384xf32>
    %44 = vector.broadcast %42 : vector<1x8x1xf32> to vector<1x8x384xf32>
    %45 = vector.broadcast %43 : vector<1x1x384xf32> to vector<1x8x384xf32>
    %46 = arith.mulf %44, %45 : vector<1x8x384xf32>
    %47 = arith.addf %39, %46 : vector<1x8x384xf32>
    %c0_15 = arith.constant 0 : index
    %c0_16 = arith.constant 0 : index
    %c36 = arith.constant 36 : index
    %48 = vector.load %arg2[%c0_15, %c0_16, %c36] : memref<1x1x512xf32, #tpu.memory_space<vmem>>, vector<1x1x384xf32>
    %49 = vector.shape_cast %48 : vector<1x1x384xf32> to vector<1x384xf32>
    %50 = vector.extract_strided_slice %0 {offsets = [0, 0, 6], sizes = [1, 8, 1], strides = [1, 1, 1]} : vector<1x8x9xf32> to vector<1x8x1xf32>
    %51 = vector.shape_cast %49 : vector<1x384xf32> to vector<1x1x384xf32>
    %52 = vector.broadcast %50 : vector<1x8x1xf32> to vector<1x8x384xf32>
    %53 = vector.broadcast %51 : vector<1x1x384xf32> to vector<1x8x384xf32>
    %54 = arith.mulf %52, %53 : vector<1x8x384xf32>
    %55 = arith.addf %47, %54 : vector<1x8x384xf32>
    %c0_17 = arith.constant 0 : index
    %c0_18 = arith.constant 0 : index
    %c37 = arith.constant 37 : index
    %56 = vector.load %arg2[%c0_17, %c0_18, %c37] : memref<1x1x512xf32, #tpu.memory_space<vmem>>, vector<1x1x384xf32>
    %57 = vector.shape_cast %56 : vector<1x1x384xf32> to vector<1x384xf32>
    %58 = vector.extract_strided_slice %0 {offsets = [0, 0, 7], sizes = [1, 8, 1], strides = [1, 1, 1]} : vector<1x8x9xf32> to vector<1x8x1xf32>
    %59 = vector.shape_cast %57 : vector<1x384xf32> to vector<1x1x384xf32>
    %60 = vector.broadcast %58 : vector<1x8x1xf32> to vector<1x8x384xf32>
    %61 = vector.broadcast %59 : vector<1x1x384xf32> to vector<1x8x384xf32>
    %62 = arith.mulf %60, %61 : vector<1x8x384xf32>
    %63 = arith.addf %55, %62 : vector<1x8x384xf32>
    %c0_19 = arith.constant 0 : index
    %c0_20 = arith.constant 0 : index
    %c38 = arith.constant 38 : index
    %64 = vector.load %arg2[%c0_19, %c0_20, %c38] : memref<1x1x512xf32, #tpu.memory_space<vmem>>, vector<1x1x384xf32>
    %65 = vector.shape_cast %64 : vector<1x1x384xf32> to vector<1x384xf32>
    %66 = vector.extract_strided_slice %0 {offsets = [0, 0, 8], sizes = [1, 8, 1], strides = [1, 1, 1]} : vector<1x8x9xf32> to vector<1x8x1xf32>
    %67 = vector.shape_cast %65 : vector<1x384xf32> to vector<1x1x384xf32>
    %68 = vector.broadcast %66 : vector<1x8x1xf32> to vector<1x8x384xf32>
    %69 = vector.broadcast %67 : vector<1x1x384xf32> to vector<1x8x384xf32>
    %70 = arith.mulf %68, %69 : vector<1x8x384xf32>
    %71 = arith.addf %63, %70 : vector<1x8x384xf32>
    %c0_21 = arith.constant 0 : index
    %c0_22 = arith.constant 0 : index
    %c0_23 = arith.constant 0 : index
    %72 = vector.load %arg4[%c0_21, %c0_22, %c0_23] : memref<1x8x384xf32, #tpu.memory_space<vmem>>, vector<1x8x384xf32>
    tpu.vector_store %arg4[%c0_21, %c0_22, %c0_23], %71 {strides = array<i32>} : memref<1x8x384xf32, #tpu.memory_space<vmem>>, vector<1x8x384xf32>,
    return
  }
  func.func @transform_0(%arg0: i32, %arg1: i32) -> (i32, i32, i32) {
    %c0_i32 = arith.constant 0 : i32
    %c0_i32_0 = arith.constant 0 : i32
    %c0_i32_1 = arith.constant 0 : i32
    return %arg0, %c0_i32, %c0_i32_0 : i32, i32, i32
  }
  func.func @transform_1(%arg0: i32, %arg1: i32) -> (i32, i32, i32) {
    %c0_i32 = arith.constant 0 : i32
    %c0_i32_0 = arith.constant 0 : i32
    %c0_i32_1 = arith.constant 0 : i32
    return %c0_i32, %arg1, %c0_i32_0 : i32, i32, i32
  }
  func.func @transform_2(%arg0: i32, %arg1: i32) -> (i32, i32, i32) {
    %c0_i32 = arith.constant 0 : i32
    %c0_i32_0 = arith.constant 0 : i32
    return %arg0, %arg1, %c0_i32 : i32, i32, i32
  }
}

</mosaic_0001>

<bundles_post_ra>
// kernel: tpu_custom_call.1
= control target key start
LH: loop header
LB: loop body
LE: loop exit
PB: predicated region body
PF: predicated region fallthrough
CT: control target
= control target key end

     0   :  { %7 = vsyncpa [#allocation3], 0  ;;  %s1196_s0 = inlined_call_operand.hbm [shape: f32[2,1,512], index: 0, kind: input, shape index: {}]   ;;  %s1197_s1 = inlined_call_operand.hbm [shape: f32[1,8,9], index: 1, kind: input, shape index: {}]   ;;  %s1198_s2 = inlined_call_operand.hbm [shape: f32[2,8,384], index: 2, kind: output, shape index: {}]  }
   0x1   :  { %9 = vsyncpa [#allocation3 + $0x1], 0 }
   0x2   :  { %10 = vsyncpa [#allocation6], 0 }
   0x3   :  { %11 = vsyncpa [#allocation4], 0 }
   0x4   :  { %13 = vsyncpa [#allocation4 + $0x1], 0  ;;  %s893_s9 = smov 0   ;;  %s895_s10 = smov 0  }
   0x5   :  { %s897_s11 = smov 0   ;;  %s899_s12 = smov 0  }
   0x6   :  { %s901_s13 = smov 0   ;;  %s903_s14 = smov 0  }
   0x7 LB: > { %s595_s15 = sadd.s32 4294967295, %s856_s14   ;;  %s596_s16 = sadd.s32 4294967294, %s856_s14   ;;  %s856_s14 = sphi %s903_s14, %s19_s14   ;;  %s852_s13 = sphi %s901_s13, %s1223_s13   ;;  %s848_s12 = sphi %s899_s12, %s1222_s12   ;;  %s844_s11 = sphi %s897_s11, %s1221_s11   ;;  %s840_s10 = sphi %s895_s10, %s1220_s10   ;;  %s836_s9 = sphi %s893_s9, %s1219_s9  }
   0x8   : > { %p51_p0 = scmp.ne.s32.totalorder %s840_s10, %s836_s9  ;;  %p927_p1 = scmp.eq.s32.totalorder %s595_s15, 0 }
   0x9   : > { %p931_p2 = scmp.eq.s32.totalorder %s595_s15, 1  ;;  %p109_p3 = scmp.eq.s32.totalorder %s596_s16, 1 }
   0xa   : > { %s1203_s17 = scalar_select %p927_p1, 1, 0 }
   0xb   : > { %s1204_s18 = scalar_select %p931_p2, 1, 0 }
   0xc   : > { %p937_p4 = por %p927_p1, %p51_p0  ;;  %p597_p5 = scmp.ge.s32.totalorder %s856_s14, 1 }
   0xd   : > { %p942_p6 = por %p109_p3, %p51_p0  ;;  %p116_p7 = scmp.lt.s32.totalorder %s856_s14, 3 }
   0xe   : > { %s1205_s19 = scalar_select %p937_p4, 1, 0 }
   0xf   : > { %s1206_s20 = scalar_select %p942_p6, 1, 0 }
  0x10   : > { %p947_p8 = pnand %p597_p5, %p116_p7  ;;  %s858_s22 = smov [#allocation5]  }
  0x11   : > { %s131_s23 = sshll.u32 %s858_s22, 4  ;;  %s31_s25 = sadd.s32 1, %s852_s13  ;;  %s132_s23 = int_to_ptr.vmem [resolvable:$true] %s131_s23 }
  0x12   : > { %s1207_s21 = scalar_select %p947_p8, 1, 0 }
  0x13   : > { %p620_p10 = pneg %p947_p8  ;;  %s38_s26 = sadd.s32 1, %s844_s11 }
  0x14   : > { %p962_p12 = scmp.ge.s32.totalorder %s31_s25, 2  ;;  %s712_s30 = scalar_lea.hbm %s1197_s1, 128 }
  0x15   : > { %p956_p11 = pnand %p620_p10, %p927_p1  ;;  %p713_p13 = scmp.ne.s32.totalorder %s1197_s1, %s712_s30 }
  0x16   : > { %s1209_s27 = scalar_select %p962_p12, 1, 0 }
  0x17   : > { %p714_p0 = pneg %p956_p11  ;;  %p719_p7 = scmp.lt.u32.totalorder %s712_s30, %s1197_s1 }
  0x19   : > { %p715_p3 = pnand %p714_p0, %p713_p13 }
  0x1b   : > { %p716_p5 = pneg %p715_p3 }
  0x1d   : > { %p721_p10 = pnand %p719_p7, %p716_p5 }
  0x1f   : > { %724 = shalt.err (!%p721_p10)
}
  0x20   : > { %s725_s7 = scalar_lea.vmem %s132_s23, 128  ;;  %p733_p4 = scmp.lt.s32.totalorder %s132_s23, %s132_s23 }
  0x21   : > { %p726_p9 = scmp.ne.s32.totalorder %s132_s23, %s725_s7  ;;  %p734_p8 = scmp.lt.s32.totalorder %s725_s7, %s725_s7 }
  0x23   : > { %p728_p6 = pnand %p726_p9, %p714_p0  ;;  %p735_p2 = por %p734_p8, %p733_p4 }
  0x25   : > { %p729_p1 = pneg %p728_p6 }
  0x27   : > { %p736_p12 = pnand %p735_p2, %p729_p1 }
  0x29   : > { %739 = shalt.err (!%p736_p12)
}
  0x2a   : > { %623 = dma.hbm_to_vmem [thread:$0]  (!%p956_p11), %s1197_s1, 128, %s132_s23, [#allocation6]  }
  0x2b   : > { %p1210_p4 = scmp.ne.s32.totalorder %s1209_s27, 0  ;;  %p45_p1 = scmp.ne.s32.totalorder %s844_s11, %s840_s10 }
  0x2c   : > { %p46_p2 = scmp.eq.s32.totalorder %s856_s14, 0  ;;  %p633_p6 = scmp.lt.s32.totalorder %s856_s14, 2 }
  0x2d   : > { %s1225_s25 = smov (%p1210_p4, %s31_s25), 0  ;;  %p1211_p12 = scmp.ne.s32.totalorder %s1204_s18, 0 }
  0x2e   : > { %s35_s16 = ssub.s32 %s852_s13, %s1225_s25  ;;  %p47_p9 = por %p46_p2, %p45_p1 }
  0x2f   : > { %p36_p8 = scmp.eq.s32.totalorder %s35_s16, 0  ;;  %p994_p13 = por %p1211_p12, %p45_p1 }
  0x30   : > { %s142_s24 = sand.u32 1, %s844_s11   ;;  %s609_s27 = sshll.u32 %s852_s13, 6 }
  0x31   : > { %s1002_s28 = scalar_select %p36_p8, %s844_s11, %s38_s26  }
  0x32   : > { %s600_s23 = sshll.u32 %s142_s24, 2  ;;  %s1008_s3 = scalar_lea.hbm %s1196_s0, %s609_s27 }
  0x33   : > { %s146_s18 = scalar_lea.vmem [#allocation2], %s600_s23  ;;  %p1012_p11 = pnand %p633_p6, %p47_p9 }
  0x34   : > { %s154_s4 = sshll.u32 %s146_s18, 4  ;;  %s143_s26 = scalar_lea.sflag [#allocation3], %s142_s24  ;;  %s1010_s4 = int_to_ptr.vmem [resolvable:$true] %s154_s4 }
  0x35   : > { %s740_s6 = scalar_lea.hbm %s1008_s3, 64  ;;  %p742_p3 = pneg %p1012_p11 }
  0x36   : > { %p741_p0 = scmp.ne.s32.totalorder %s1008_s3, %s740_s6  ;;  %s745_s15 = scalar_lea.hbm %s1196_s0, 128 }
  0x37   : > { %p746_p10 = scmp.lt.u32.totalorder %s1008_s3, %s1196_s0  ;;  %p747_p4 = scmp.lt.u32.totalorder %s745_s15, %s740_s6 }
  0x38   : > { %p743_p5 = pnand %p742_p3, %p741_p0  ;;  %p749_p2 = scmp.lt.u32.totalorder %s740_s6, %s1008_s3 }
  0x39   : > { %p748_p1 = por %p747_p4, %p746_p10 }
  0x3a   : > { %p744_p7 = pneg %p743_p5 }
  0x3b   : > { %p750_p6 = por %p749_p2, %p748_p1 }
  0x3d   : > { %p751_p8 = pnand %p750_p6, %p744_p7 }
  0x3f   : > { %754 = shalt.err (!%p751_p8)
}
  0x40   : > { %s755_s24 = scalar_lea.vmem %s1010_s4, 64  ;;  %s859_s27 = smov [#allocation2]  }
  0x41   : > { %p756_p9 = scmp.ne.s32.totalorder %s1010_s4, %s755_s24  ;;  %s760_s29 = sshll.u32 %s859_s27, 4  ;;  %s761_s29 = int_to_ptr.vmem [resolvable:$false] %s760_s29 }
  0x42   : > { %s762_s30 = scalar_lea.vmem %s761_s29, 128  ;;  %p763_p5 = scmp.lt.s32.totalorder %s1010_s4, %s761_s29 }
  0x43   : > { %p758_p12 = pnand %p756_p9, %p742_p3  ;;  %p764_p10 = scmp.lt.s32.totalorder %s762_s30, %s755_s24 }
  0x45   : > { %p759_p0 = pneg %p758_p12  ;;  %p765_p4 = por %p764_p10, %p763_p5 }
  0x47   : > { %p766_p1 = pnand %p765_p4, %p759_p0 }
  0x49   : > { %769 = shalt.err (!%p766_p1)
}
  0x4a   : > { %627 = dma.hbm_to_vmem [thread:$0]  (!%p1012_p11), %s1008_s3, 64, %s1010_s4, %s143_s26  }
  0x4b   : > { %p1214_p7 = scmp.ne.s32.totalorder %s1207_s21, 0 }
  0x4c   : > { %s1044_s18 = sand.u32 (!%p1214_p7), 1, %s840_s10   ;;  %p1215_p3 = scmp.ne.s32.totalorder (!%p1214_p7), %s1205_s19, 0 }
  0x4d   : > { %163 = sbr.rel (%p1214_p7) target bundleno = 416 (0x1a0), region = 28  ;;  %s604_s6 = sshll.u32 (!%p1214_p7), %s1044_s18, 2 }
  0x4e   : > { %s166_s7 = scalar_lea.sflag (!%p1214_p7), [#allocation3], %s1044_s18  ;;  %s1048_s8 = scalar_lea.vmem (!%p1214_p7), [#allocation2], %s604_s6 }
  0x54   : > { %823 = dma.done.wait (%p1215_p3), %s166_s7, 64  }
  0x55   : > { %825 = vsyncadd (%p1215_p3), %s166_s7, 4294967232  ;;  %p1216_p11 = scmp.ne.s32.totalorder %s1203_s17, 0 }
  0x57   : > { %827 = dma.done.wait (%p1216_p11), [#allocation6], 128  }
  0x58   : > { %829 = vsyncadd (%p1216_p11), [#allocation6], 4294967168  ;;  %v860_v0 = vmov 1   ;;  %v861_v1 = vmov 3   ;;  %v194_v2 = vld [vmem:[#allocation5] sm:$0xff]  ;;  %v862_v3 = vmov 2   ;;  %v202_v10 = vlaneseq }
  0x59   : > { %702 = vset.pattern.permute.xlu0 %v860_v0  ;;  %704 = vset.pattern.permute.xlu1 %v861_v1  ;;  %v863_v4 = vmov 4   ;;  %v864_v5 = vmov 5   ;;  %v865_v6 = vmov 6   ;;  %v866_v7 = vmov 7   ;;  %v220_v14 = vld [vmem:[%s1048_s8] sm:$0xf] }
  0x5a   : > { %222 = vperm.xlu0 %702, %v194_v2   ;;  %303 = vperm.xlu1 %704, %v194_v2   ;;  %v867_v8 = vmov 0   ;;  %v868_v9 = vmov 8   ;;  %v1058_v11 = vshrl.u32 %v202_v10, 7  ;;  %s869_s17 = smov 127   ;;  %s870_s19 = smov 126   ;;  %vm262_vm0 = vcmask 1039360  }
  0x5b   : > { %s871_s21 = smov 110   ;;  %s872_s3 = smov 109   ;;  %vm292_vm1 = vcmask 1031168   ;;  %vm322_vm2 = vcmask 900096   ;;  %vm352_vm3 = vcmask 891904   ;;  %vm382_vm4 = vcmask 883712  }
  0x5c   : > { %v212_v12 = vsub.s32 2, %v1058_v11  ;;  %v204_v13 = vsub.s32 0, %v1058_v11  ;;  %v208_v17 = vsub.s32 1, %v1058_v11  ;;  %v240_v22 = vsub.s32 3, %v1058_v11  ;;  %s873_s4 = smov 108   ;;  %s874_s5 = smov 92  }
  0x5d   : > { %s875_s26 = smov 91   ;;  %s876_s15 = smov 90   ;;  %vm412_vm5 = vcmask 752640   ;;  %vm442_vm6 = vcmask 744448   ;;  %vm472_vm7 = vcmask 736256  }
  0x5e   : > { %703 = vset.pattern.permute.xlu0 %v862_v3  ;;  %705 = vset.pattern.permute.xlu1 %v863_v4  ;;  %v1065_v15 = vrot.slane %v220_v14, %v212_v12  ;;  %v1069_v16 = vrot.slane %v220_v14, %v204_v13  ;;  %v1076_v21 = vrot.slane %v220_v14, %v208_v17  ;;  %s610_s16 = smul.u32 24, %s1044_s18 }
  0x5f   : > { %273 = vperm.xlu0 %703, %v194_v2   ;;  %333 = vperm.xlu1 %705, %v194_v2   ;;  %v1080_v25 = vrot.slane %v220_v14, %v240_v22  ;;  %s611_s23 = smul.u32 384, %s848_s12  ;;  %s486_s12 = scalar_lea.sflag [#allocation4], %s1044_s18 }
  0x60   : > { %s193_s24 = scalar_lea.vmem [#allocation7], %s610_s16 }
  0x61   : > { %s502_s27 = sshll.u32 %s193_s24, 4  ;;  %s1147_s6 = scalar_lea.hbm %s1198_s2, %s611_s23  ;;  %s1149_s27 = int_to_ptr.vmem [resolvable:$true] %s502_s27 }
  0x62   : > { %s770_s7 = scalar_lea.vmem %s1149_s27, 384 }
  0x63   : > { %706 = vset.pattern.permute.xlu1 %v864_v5  ;;  %707 = vset.pattern.permute.xlu0 %v865_v6  ;;  %p771_p2 = scmp.ne.s32.totalorder %s1149_s27, %s770_s7 }
  0x64   : > { %363 = vperm.xlu1 %706, %v194_v2   ;;  %393 = vperm.xlu0 %707, %v194_v2  }
  0x65   : > { %p772_p6 = pnand %p771_p2, %p994_p13 }
  0x67   : > { %p773_p8 = pneg %p772_p6 }
  0x68   : > { %708 = vset.pattern.permute.xlu1 %v866_v7  ;;  %710 = vset.pattern.permute.xlu0 %v867_v8 }
  0x69   : > { %423 = vperm.xlu1 %708, %v194_v2   ;;  %198 = vperm.xlu0 %710, %v194_v2  }
  0x6d   : > { %709 = vset.pattern.permute.xlu1 %v868_v9  ;;  %711 = vset.pattern.permute.xlu0 %v868_v9 }
  0x6e   : > { %453 = vperm.xlu1 %709, %v194_v2  }
  0xd9   : > { %v223_v18 = vpop.permute.xlu0 %222  ;;  %v304_v29 = vpop.permute.xlu1 %303 }
  0xda   : > { %v248_v19 = vmul.f32 %v1065_v15, %v223_v18  ;;  %v246_v20 = vmul.f32 %v1069_v16, %v223_v18  ;;  %v247_v23 = vmul.f32 %v1076_v21, %v223_v18  ;;  %v249_v28 = vmul.f32 %v1080_v25, %v223_v18 }
  0xdb   : > { %v306_v31 = vmul.f32 %v304_v29, %v1069_v16  ;;  %v308_v32 = vmul.f32 %v304_v29, %v1065_v15  ;;  %v307_v35 = vmul.f32 %v304_v29, %v1076_v21  ;;  %v309_v38 = vmul.f32 %v304_v29, %v1080_v25 }
  0xdc   : > { %258 = vrot.lane.b32.xlu0 %v248_v19, %s869_s17  ;;  %254 = vrot.lane.b32.xlu1 %v246_v20, %s869_s17 }
  0xde   : > { %v274_v24 = vpop.permute.xlu0 %273  ;;  %v334_v34 = vpop.permute.xlu1 %333 }
  0xdf   : > { %v276_v26 = vmul.f32 %v274_v24, %v1069_v16  ;;  %v278_v27 = vmul.f32 %v274_v24, %v1065_v15  ;;  %v277_v30 = vmul.f32 %v274_v24, %v1076_v21  ;;  %v279_v33 = vmul.f32 %v274_v24, %v1080_v25 }
  0xe0   : > { %256 = vrot.lane.b32.xlu1 %v247_v23, %s869_s17  ;;  %v336_v36 = vmul.f32 %v334_v34, %v1069_v16  ;;  %v338_v37 = vmul.f32 %v334_v34, %v1065_v15  ;;  %v337_v40 = vmul.f32 %v334_v34, %v1076_v21  ;;  %v339_v43 = vmul.f32 %v334_v34, %v1080_v25 }
  0xe1   : > { %284 = vrot.lane.b32.xlu0 %v276_v26, %s870_s19 }
  0xe3   : > { %v364_v39 = vpop.permute.xlu1 %363  ;;  %v394_v44 = vpop.permute.xlu0 %393 }
  0xe4   : > { %260 = vrot.lane.b32.xlu1 %v249_v28, %s869_s17  ;;  %v366_v41 = vmul.f32 %v364_v39, %v1069_v16  ;;  %v368_v42 = vmul.f32 %v364_v39, %v1065_v15  ;;  %v367_v45 = vmul.f32 %v364_v39, %v1076_v21  ;;  %v396_v46 = vmul.f32 %v394_v44, %v1069_v16 }
  0xe5   : > { %288 = vrot.lane.b32.xlu0 %v278_v27, %s870_s19  ;;  %v398_v47 = vmul.f32 %v394_v44, %v1065_v15  ;;  %v369_v48 = vmul.f32 %v364_v39, %v1080_v25  ;;  %v397_v50 = vmul.f32 %v394_v44, %v1076_v21  ;;  %v399_v53 = vmul.f32 %v394_v44, %v1080_v25 }
  0xe8   : > { %286 = vrot.lane.b32.xlu1 %v277_v30, %s870_s19  ;;  %v424_v49 = vpop.permute.xlu1 %423  ;;  %v199_v61 = vpop.permute.xlu0 %198 }
  0xe9   : > { %314 = vrot.lane.b32.xlu0 %v306_v31, %s871_s21  ;;  %v426_v51 = vmul.f32 %v424_v49, %v1069_v16  ;;  %v428_v52 = vmul.f32 %v424_v49, %v1065_v15  ;;  %v427_v55 = vmul.f32 %v424_v49, %v1076_v21  ;;  %v429_v58 = vmul.f32 %v424_v49, %v1080_v25 }
  0xec   : > { %290 = vrot.lane.b32.xlu1 %v279_v33, %s870_s19 }
  0xed   : > { %318 = vrot.lane.b32.xlu0 %v308_v32, %s871_s21  ;;  %v454_v54 = vpop.permute.xlu1 %453 }
  0xee   : > { %v456_v56 = vmul.f32 %v454_v54, %v1069_v16  ;;  %v458_v57 = vmul.f32 %v454_v54, %v1065_v15  ;;  %v457_v59 = vmul.f32 %v454_v54, %v1076_v21  ;;  %v459_v60 = vmul.f32 %v454_v54, %v1080_v25  ;;  %v195_v21 = vld [vmem:[%s1048_s8] sm:$0x7]  ;;  %s877_s8 = smov [#allocation7]  }
  0xef   : > { %v205_v23 = vrot.slane %v195_v21, %v204_v13  ;;  %v209_v24 = vrot.slane %v195_v21, %v208_v17  ;;  %v213_v33 = vrot.slane %v195_v21, %v212_v12  ;;  %s774_s17 = sshll.u32 %s877_s8, 4  ;;  %s775_s17 = int_to_ptr.vmem [resolvable:$false] %s774_s17 }
  0xf0   : > { %316 = vrot.lane.b32.xlu1 %v307_v35, %s871_s21  ;;  %s776_s19 = scalar_lea.vmem %s775_s17, 768  ;;  %p777_p9 = scmp.lt.s32.totalorder %s1149_s27, %s775_s17 }
  0xf1   : > { %344 = vrot.lane.b32.xlu0 %v336_v36, %s872_s3  ;;  %v217_v27 = vmul.f32 %v205_v23, %v199_v61  ;;  %v218_v28 = vmul.f32 %v209_v24, %v199_v61  ;;  %p778_p12 = scmp.lt.s32.totalorder %s776_s19, %s770_s7 }
  0xf3   : > { %p779_p0 = por %p778_p12, %p777_p9 }
  0xf4   : > { %320 = vrot.lane.b32.xlu1 %v309_v38, %s871_s21 }
  0xf5   : > { %348 = vrot.lane.b32.xlu0 %v338_v37, %s872_s3  ;;  %p780_p5 = pnand %p779_p0, %p773_p8 }
  0xf8   : > { %346 = vrot.lane.b32.xlu1 %v337_v40, %s872_s3 }
  0xf9   : > { %374 = vrot.lane.b32.xlu0 %v366_v41, %s873_s4  ;;  %v219_v41 = vmul.f32 %v213_v33, %v199_v61 }
  0xfc   : > { %350 = vrot.lane.b32.xlu1 %v339_v43, %s872_s3 }
  0xfd   : > { %378 = vrot.lane.b32.xlu0 %v368_v42, %s873_s4 }
 0x100   : > { %376 = vrot.lane.b32.xlu1 %v367_v45, %s873_s4 }
 0x101   : > { %404 = vrot.lane.b32.xlu0 %v396_v46, %s874_s5 }
 0x104   : > { %380 = vrot.lane.b32.xlu1 %v369_v48, %s873_s4 }
 0x105   : > { %408 = vrot.lane.b32.xlu0 %v398_v47, %s874_s5 }
 0x108   : > { %406 = vrot.lane.b32.xlu1 %v397_v50, %s874_s5 }
 0x109   : > { %434 = vrot.lane.b32.xlu0 %v426_v51, %s875_s26 }
 0x10c   : > { %410 = vrot.lane.b32.xlu1 %v399_v53, %s874_s5 }
 0x10d   : > { %438 = vrot.lane.b32.xlu0 %v428_v52, %s875_s26 }
 0x110   : > { %436 = vrot.lane.b32.xlu1 %v427_v55, %s875_s26 }
 0x111   : > { %464 = vrot.lane.b32.xlu0 %v456_v56, %s876_s15 }
 0x114   : > { %440 = vrot.lane.b32.xlu1 %v429_v58, %s875_s26 }
 0x115   : > { %468 = vrot.lane.b32.xlu0 %v458_v57, %s876_s15 }
 0x118   : > { %466 = vrot.lane.b32.xlu1 %v457_v59, %s876_s15 }
 0x11c   : > { %470 = vrot.lane.b32.xlu1 %v459_v60, %s876_s15 }
 0x14e   : > { %v255_v62 = vpop.permute.xlu1 %254  ;;  %v259_v63 = vpop.permute.xlu0 %258 }
 0x152   : > { %v257_v0 = vpop.permute.xlu1 %256 }
 0x153   : > { %v285_v1 = vpop.permute.xlu0 %284  ;;  %v263_v30 = vsel %vm262_vm0, %v255_v62, %v257_v0  ;;  %v264_v31 = vsel %vm262_vm0, %v257_v0, %v259_v63 }
 0x154   : > { %v269_v34 = vadd.f32 %v263_v30, %v217_v27  ;;  %v270_v35 = vadd.f32 %v264_v31, %v218_v28 }
 0x156   : > { %v261_v2 = vpop.permute.xlu1 %260 }
 0x157   : > { %v289_v3 = vpop.permute.xlu0 %288  ;;  %v265_v37 = vsel %vm262_vm0, %v259_v63, %v261_v2 }
 0x158   : > { %v271_v45 = vadd.f32 %v265_v37, %v219_v41 }
 0x15a   : > { %v287_v4 = vpop.permute.xlu1 %286 }
 0x15b   : > { %v315_v5 = vpop.permute.xlu0 %314  ;;  %v293_v13 = vsel %vm292_vm1, %v285_v1, %v287_v4  ;;  %v294_v17 = vsel %vm292_vm1, %v287_v4, %v289_v3 }
 0x15c   : > { %v299_v42 = vadd.f32 %v293_v13, %v269_v34  ;;  %v300_v11 = vadd.f32 %v294_v17, %v270_v35 }
 0x15e   : > { %v291_v6 = vpop.permute.xlu1 %290 }
 0x15f   : > { %v319_v7 = vpop.permute.xlu0 %318  ;;  %v295_v12 = vsel %vm292_vm1, %v289_v3, %v291_v6 }
 0x160   : > { %v301_v53 = vadd.f32 %v295_v12, %v271_v45 }
 0x162   : > { %v317_v8 = vpop.permute.xlu1 %316 }
 0x163   : > { %v345_v9 = vpop.permute.xlu0 %344  ;;  %v323_v38 = vsel %vm322_vm2, %v315_v5, %v317_v8  ;;  %v324_v39 = vsel %vm322_vm2, %v317_v8, %v319_v7 }
 0x164   : > { %v329_v46 = vadd.f32 %v323_v38, %v299_v42  ;;  %v330_v47 = vadd.f32 %v324_v39, %v300_v11 }
 0x166   : > { %v321_v10 = vpop.permute.xlu1 %320 }
 0x167   : > { %v349_v14 = vpop.permute.xlu0 %348  ;;  %v325_v49 = vsel %vm322_vm2, %v319_v7, %v321_v10 }
 0x168   : > { %v331_v59 = vadd.f32 %v325_v49, %v301_v53 }
 0x16a   : > { %v347_v15 = vpop.permute.xlu1 %346 }
 0x16b   : > { %v375_v16 = vpop.permute.xlu0 %374  ;;  %v353_v43 = vsel %vm352_vm3, %v345_v9, %v347_v15  ;;  %v354_v44 = vsel %vm352_vm3, %v347_v15, %v349_v14 }
 0x16c   : > { %v359_v54 = vadd.f32 %v353_v43, %v329_v46  ;;  %v360_v55 = vadd.f32 %v354_v44, %v330_v47 }
 0x16e   : > { %v351_v18 = vpop.permute.xlu1 %350 }
 0x16f   : > { %v379_v19 = vpop.permute.xlu0 %378  ;;  %v355_v56 = vsel %vm352_vm3, %v349_v14, %v351_v18 }
 0x170   : > { %v361_v2 = vadd.f32 %v355_v56, %v331_v59 }
 0x172   : > { %v377_v20 = vpop.permute.xlu1 %376 }
 0x173   : > { %v405_v22 = vpop.permute.xlu0 %404  ;;  %v383_v50 = vsel %vm382_vm4, %v375_v16, %v377_v20  ;;  %v384_v51 = vsel %vm382_vm4, %v377_v20, %v379_v19 }
 0x174   : > { %v389_v60 = vadd.f32 %v383_v50, %v359_v54  ;;  %v390_v61 = vadd.f32 %v384_v51, %v360_v55 }
 0x176   : > { %v381_v25 = vpop.permute.xlu1 %380 }
 0x177   : > { %v409_v26 = vpop.permute.xlu0 %408  ;;  %v385_v63 = vsel %vm382_vm4, %v379_v19, %v381_v25 }
 0x178   : > { %v391_v7 = vadd.f32 %v385_v63, %v361_v2 }
 0x17a   : > { %v407_v29 = vpop.permute.xlu1 %406 }
 0x17b   : > { %v435_v32 = vpop.permute.xlu0 %434  ;;  %v413_v57 = vsel %vm412_vm5, %v405_v22, %v407_v29  ;;  %v414_v58 = vsel %vm412_vm5, %v407_v29, %v409_v26 }
 0x17c   : > { %v419_v3 = vadd.f32 %v413_v57, %v389_v60  ;;  %v420_v4 = vadd.f32 %v414_v58, %v390_v61 }
 0x17e   : > { %v411_v36 = vpop.permute.xlu1 %410 }
 0x17f   : > { %v439_v40 = vpop.permute.xlu0 %438  ;;  %v415_v6 = vsel %vm412_vm5, %v409_v26, %v411_v36 }
 0x180   : > { %v421_v18 = vadd.f32 %v415_v6, %v391_v7 }
 0x182   : > { %v437_v48 = vpop.permute.xlu1 %436 }
 0x183   : > { %v465_v52 = vpop.permute.xlu0 %464  ;;  %v443_v0 = vsel %vm442_vm6, %v435_v32, %v437_v48  ;;  %v444_v1 = vsel %vm442_vm6, %v437_v48, %v439_v40 }
 0x184   : > { %v449_v8 = vadd.f32 %v443_v0, %v419_v3  ;;  %v450_v9 = vadd.f32 %v444_v1, %v420_v4 }
 0x186   : > { %v441_v62 = vpop.permute.xlu1 %440 }
 0x187   : > { %v469_v5 = vpop.permute.xlu0 %468  ;;  %v445_v14 = vsel %vm442_vm6, %v439_v40, %v441_v62 }
 0x188   : > { %v451_v21 = vadd.f32 %v445_v14, %v421_v18 }
 0x18a   : > { %v467_v10 = vpop.permute.xlu1 %466 }
 0x18b   : > { %v473_v15 = vsel %vm472_vm7, %v465_v52, %v467_v10  ;;  %v474_v16 = vsel %vm472_vm7, %v467_v10, %v469_v5 }
 0x18c   : > { %v479_v19 = vadd.f32 %v473_v15, %v449_v8  ;;  %v480_v20 = vadd.f32 %v474_v16, %v450_v9 }
 0x18e   : > { %482 = vst [vmem:[%s193_s24] sm:$0xff] %v479_v19  ;;  %483 = vst [vmem:[%s193_s24 + $0x8] sm:$0xff] %v480_v20  ;;  %v471_v22 = vpop.permute.xlu1 %470 }
 0x18f   : > { %v475_v23 = vsel %vm472_vm7, %v469_v5, %v471_v22 }
 0x190   : > { %v481_v24 = vadd.f32 %v475_v23, %v451_v21 }
 0x192   : > { %484 = vst [vmem:[%s193_s24 + $0x10] sm:$0xff] %v481_v24 }
 0x193   : > { %783 = shalt.err (!%p780_p5)
}
 0x194   : > { %s784_s18 = scalar_lea.hbm %s1147_s6, 384  ;;  %s788_s4 = scalar_lea.hbm %s1198_s2, 768 }
 0x195   : > { %p785_p10 = scmp.ne.s32.totalorder %s1147_s6, %s784_s18  ;;  %p789_p7 = scmp.lt.u32.totalorder %s1147_s6, %s1198_s2 }
 0x196   : > { %p790_p3 = scmp.lt.u32.totalorder %s788_s4, %s784_s18  ;;  %p792_p2 = scmp.lt.u32.totalorder %s784_s18, %s1147_s6 }
 0x197   : > { %p786_p4 = pnand %p785_p10, %p994_p13 }
 0x198   : > { %p791_p11 = por %p790_p3, %p789_p7 }
 0x199   : > { %p787_p1 = pneg %p786_p4 }
 0x19a   : > { %p793_p6 = por %p792_p2, %p791_p11 }
 0x19c   : > { %p794_p8 = pnand %p793_p6, %p787_p1 }
 0x19e   : > { %797 = shalt.err (!%p794_p8)
}
 0x19f   : > { %618 = dma.vmem_to_hbm [thread:$0]  (%p994_p13), %s1149_s27, 384, %s1147_s6, %s486_s12  }
 0x1a0 PF: > { %s514_s15 = sand.u32 1, %s836_s9   ;;  %p1217_p9 = scmp.ne.s32.totalorder %s1206_s20, 0 }
 0x1a1   : > { %p1218_p12 = scmp.ge.s32.totalorder %s856_s14, 2  ;;  %s515_s16 = scalar_lea.sflag [#allocation4], %s514_s15 }
 0x1a3   : > { %p629_p0 = pnand %p1218_p12, %p1217_p9 }
 0x1a5   : > { %831 = dma.done.wait (!%p629_p0), %s515_s16, 384  }
 0x1a6   : > { %833 = vsyncadd (!%p629_p0), %s515_s16, 4294966912  ;;  %s19_s14 = sadd.s32 1, %s856_s14   ;;  %s1219_s9 = smov %s840_s10 }
 0x1a7   : > { %p16_p5 = scmp.ge.s32.totalorder %s19_s14, 4   ;;  %s1220_s10 = smov %s844_s11 }
 0x1a8   : > { %s1221_s11 = smov %s1002_s28  ;;  %s1222_s12 = smov %s852_s13 }
 0x1a9   : > { %s1223_s13 = smov %s1225_s25  ;;  %18 = sbr.rel (!%p16_p5) target bundleno = 7 (0x7), region = 78 }
 0x1b0   :  { %520 = vsyncpa [#allocation3], 1 }
 0x1b1   :  { %522 = vsyncpa [#allocation3 + $0x1], 1 }
 0x1b2   :  { %523 = vsyncpa [#allocation6], 1 }
 0x1b3   :  { %524 = vsyncpa [#allocation4], 1 }
 0x1b4   :  { %526 = vsyncpa [#allocation4 + $0x1], 1 }

</bundles_post_ra>
